<compile_context>
chip_gen: v6e
topology: v6e:2x2x1
jax: 0.10.0
libtpu: 0.0.40
codegen_flags: <defaults>
</compile_context>

<pallas_src>
import functools
import math

import jax
import jax.numpy as jnp
from jax.experimental import pallas as pl
from jax.experimental.pallas import tpu as pltpu


# --------------------------------------------------------------------------- kernels
def _gln_grouped_kernel(nb, eps, x_ref, w_ref, b_ref, o_ref):
    """Path A: x_ref/o_ref (bt, D); w_ref/b_ref (1, D).  Groups are lane-aligned
    (dg % 128 == 0, or nb == 1), so each group is normalized and stored directly."""
    dg = x_ref.shape[-1] // nb
    for g in range(nb):                      # static unroll; static lane-aligned slices
        sl = slice(g * dg, (g + 1) * dg)
        xg = x_ref[:, sl].astype(jnp.float32)
        mu = jnp.mean(xg, axis=-1, keepdims=True)
        xc = xg - mu
        var = jnp.mean(xc * xc, axis=-1, keepdims=True)
        y = xc * jax.lax.rsqrt(var + eps)
        o_ref[:, sl] = (y * w_ref[:, sl].astype(jnp.float32)
                        + b_ref[:, sl].astype(jnp.float32)).astype(o_ref.dtype)


def _gln_folded_kernel(eps, x_ref, w_ref, b_ref, o_ref):
    """Path B: groups folded into rows.  x_ref/o_ref (bt, dg); w_ref/b_ref (bt, dg)
    carry the group-periodic affine pattern (tiles start on group boundaries)."""
    x = x_ref[...].astype(jnp.float32)
    mu = jnp.mean(x, axis=-1, keepdims=True)
    xc = x - mu
    var = jnp.mean(xc * xc, axis=-1, keepdims=True)
    y = xc * jax.lax.rsqrt(var + eps)
    o_ref[...] = (y * w_ref[...].astype(jnp.float32)
                  + b_ref[...].astype(jnp.float32)).astype(o_ref.dtype)


# --------------------------------------------------------------------------- wrapper
def _vmem_budget_bytes():
    """Per-core VMEM budget: ~75% of physical, capped (48 MiB on v7x, 96 MiB v5e/v6e)."""
    cap = 64 << 20
    try:
        info = pltpu.get_tpu_info()
        cap = int(getattr(info, "vmem_capacity_bytes", cap) or cap)
    except Exception:
        pass
    return int(min((cap * 3) // 4, 96 << 20))


def _choose_row_tile(rows, lane, itemsize, align, budget):
    """Row-tile size: a multiple of `align` (or == rows), sized against the VMEM
    budget, preferring an exact divisor of `rows` and >= 2 grid steps (v7x megacore)."""
    lane_p = -(-lane // 128) * 128                       # lane padding in VMEM
    bytes_per_row = lane_p * (4 * itemsize + 5 * 4)      # in/out double-buffered + f32 temps + w/b
    cap = max(align, (budget // bytes_per_row) // align * align)
    if rows <= align or (rows % align != 0 and rows <= cap):
        return rows                                      # single full-extent block (always legal)
    upper = min(cap, max(align, (rows // 2) // align * align))   # aim for >= 2 grid steps
    best = 0
    if rows % align == 0:
        q = rows // align
        f = 1
        while f * f <= q:                                # largest mult-of-align divisor <= upper
            if q % f == 0:
                for d in (f, q // f):
                    bt = d * align
                    if best < bt <= upper:
                        best = bt
            f += 1
        if best >= max(align, upper // 4):
            return best                                  # exact tiling, no ragged block
    return max(best, upper)                              # ragged final block (OOB rows masked)


def group_layer_norm(x, weight, bias, nb, eps=1e-6):
    """Pallas GroupLayerNorm.  x: (B, L, D); weight/bias: any shape of size D."""
    B, L, D = x.shape
    assert D % nb == 0, "dim must be divisible by num_rims"
    dg = D // nb
    rows = B * L
    itemsize = jnp.dtype(x.dtype).itemsize
    budget = _vmem_budget_bytes()

    if nb == 1 or dg % 128 == 0:
        # ---- Path A: lane-aligned groups, per-group direct stores.
        x2 = x.reshape(rows, D)
        w2 = weight.reshape(1, D)
        b2 = bias.reshape(1, D)
        bt = _choose_row_tile(rows, D, itemsize, 8, budget)
        grid = (pl.cdiv(rows, bt),)
        kernel = functools.partial(_gln_grouped_kernel, nb, eps)
        in_specs = [
            pl.BlockSpec((bt, D), lambda i: (i, 0)),     # activation row tile
            pl.BlockSpec((1, D), lambda i: (0, 0)),      # weight (resident)
            pl.BlockSpec((1, D), lambda i: (0, 0)),      # bias   (resident)
        ]
        out_spec = pl.BlockSpec((bt, D), lambda i: (i, 0))
        out_shape = jax.ShapeDtypeStruct((rows, D), x.dtype)
    else:
        # ---- Path B: fold groups into the row axis (free contiguous reshape).
        rows_f = rows * nb
        align = (8 * nb) // math.gcd(8, nb)              # lcm(8, nb): 8-row blocks + group-aligned tiles
        bt = _choose_row_tile(rows_f, dg, itemsize, align, budget)
        assert bt % nb == 0                              # tiles start on group boundaries
        x2 = x.reshape(rows_f, dg)
        w2 = jnp.tile(weight.reshape(nb, dg), (bt // nb, 1))   # tiny, built once in XLA
        b2 = jnp.tile(bias.reshape(nb, dg), (bt // nb, 1))
        grid = (pl.cdiv(rows_f, bt),)
        kernel = functools.partial(_gln_folded_kernel, eps)
        in_specs = [
            pl.BlockSpec((bt, dg), lambda i: (i, 0)),    # activation row tile
            pl.BlockSpec((bt, dg), lambda i: (0, 0)),    # group-periodic weight (resident)
            pl.BlockSpec((bt, dg), lambda i: (0, 0)),    # group-periodic bias   (resident)
        ]
        out_spec = pl.BlockSpec((bt, dg), lambda i: (i, 0))
        out_shape = jax.ShapeDtypeStruct((rows_f, dg), x.dtype)

    out = pl.pallas_call(
        kernel,
        grid=grid,
        in_specs=in_specs,
        out_specs=out_spec,
        out_shape=out_shape,
        compiler_params=pltpu.CompilerParams(
            dimension_semantics=("parallel",),
            vmem_limit_bytes=budget,
        ),
    )(x2, w2, b2)

    return out.reshape(B, L, D)


# ------------------------------------------------------------------------- reference
def _reference_group_layer_norm(x, weight, bias, nb, eps=1e-6):
    """Pure-JAX reference mirroring the PyTorch module."""
    B, L, D = x.shape
    dg = D // nb
    xr = x.reshape(B, L, nb, dg)
    mu = jnp.mean(xr, axis=-1, keepdims=True)
    var = jnp.mean((xr - mu) ** 2, axis=-1, keepdims=True)
    y = (xr - mu) / jnp.sqrt(var + eps)
    return y.reshape(B, L, D) * weight.reshape(1, 1, D) + bias.reshape(1, 1, D)


if __name__ == "__main__":
    def run_case(B, L, D, NB, key):
        kx, kw, kb = jax.random.split(key, 3)
        x = jax.random.normal(kx, (B, L, D), jnp.float32)
        # Module's init_params() uses weight=ones, bias=zeros; exercise non-trivial affine too.
        weight = jnp.ones((1, 1, D), jnp.float32) + 0.1 * jax.random.normal(kw, (1, 1, D), jnp.float32)
        bias = 0.1 * jax.random.normal(kb, (1, 1, D), jnp.float32)
        out = group_layer_norm(x, weight, bias, NB, eps=1e-6)
        jax.block_until_ready(out)
        ref = _reference_group_layer_norm(x, weight, bias, NB, eps=1e-6)
        assert out.shape == (B, L, D)
        assert jnp.allclose(out, ref, atol=1e-5, rtol=1e-5), \
            f"mismatch vs reference (B={B}, L={L}, D={D}, nb={NB})"

    key = jax.random.PRNGKey(0)
    k1, k2 = jax.random.split(key)
    run_case(2, 8, 32, 4, k1)    # dg = 8   -> group-folded path (Path B), 2 grid steps
    run_case(2, 8, 256, 2, k2)   # dg = 128 -> lane-aligned per-group path (Path A), 2 grid steps
    print("KERNEL_OK")
</pallas_src>

<mosaic_0001>
module attributes {stable_mosaic.version = 11 : i64} {
  func.func @_gln_folded_kernel(%arg0: i32, %arg1: memref<32x8xf32, #tpu.memory_space<vmem>>, %arg2: memref<32x8xf32, #tpu.memory_space<vmem>>, %arg3: memref<32x8xf32, #tpu.memory_space<vmem>>, %arg4: memref<32x8xf32, #tpu.memory_space<vmem>>) attributes {dimension_semantics = [#tpu.dimension_semantics<parallel>], iteration_bounds = array<i64: 2>, scalar_prefetch = 0 : i64, scratch_operands = 0 : i64, tpu.core_type = #tpu.core_type<tc>, window_params = [{transform_indices = @transform_0, window_bounds = array<i64: 32, 8>}, {pipeline_mode = #tpu.pipeline_mode<synchronous>, transform_indices = @transform_1, window_bounds = array<i64: 32, 8>}, {pipeline_mode = #tpu.pipeline_mode<synchronous>, transform_indices = @transform_2, window_bounds = array<i64: 32, 8>}, {transform_indices = @transform_3, window_bounds = array<i64: 32, 8>}]} {
    %c0 = arith.constant 0 : index
    %c0_0 = arith.constant 0 : index
    %0 = vector.load %arg1[%c0, %c0_0] : memref<32x8xf32, #tpu.memory_space<vmem>>, vector<32x8xf32>
    %cst = arith.constant dense<0.000000e+00> : vector<32xf32>
    %1 = vector.multi_reduction <add>, %0, %cst [1] : vector<32x8xf32> to vector<32xf32>
    %2 = vector.shape_cast %1 : vector<32xf32> to vector<32x1xf32>
    %cst_1 = arith.constant 8.000000e+00 : f32
    %3 = vector.broadcast %cst_1 : f32 to vector<32x1xf32>
    %4 = arith.divf %2, %3 : vector<32x1xf32>
    %5 = vector.broadcast %4 : vector<32x1xf32> to vector<32x8xf32>
    %6 = arith.subf %0, %5 : vector<32x8xf32>
    %7 = arith.mulf %6, %6 : vector<32x8xf32>
    %cst_2 = arith.constant dense<0.000000e+00> : vector<32xf32>
    %8 = vector.multi_reduction <add>, %7, %cst_2 [1] : vector<32x8xf32> to vector<32xf32>
    %9 = vector.shape_cast %8 : vector<32xf32> to vector<32x1xf32>
    %cst_3 = arith.constant 8.000000e+00 : f32
    %10 = vector.broadcast %cst_3 : f32 to vector<32x1xf32>
    %11 = arith.divf %9, %10 : vector<32x1xf32>
    %cst_4 = arith.constant 9.99999997E-7 : f32
    %12 = vector.broadcast %cst_4 : f32 to vector<32x1xf32>
    %13 = arith.addf %11, %12 : vector<32x1xf32>
    %14 = math.rsqrt %13 : vector<32x1xf32>
    %15 = vector.broadcast %14 : vector<32x1xf32> to vector<32x8xf32>
    %16 = arith.mulf %6, %15 : vector<32x8xf32>
    %c0_5 = arith.constant 0 : index
    %c0_6 = arith.constant 0 : index
    %17 = vector.load %arg2[%c0_5, %c0_6] : memref<32x8xf32, #tpu.memory_space<vmem>>, vector<32x8xf32>
    %18 = arith.mulf %16, %17 : vector<32x8xf32>
    %c0_7 = arith.constant 0 : index
    %c0_8 = arith.constant 0 : index
    %19 = vector.load %arg3[%c0_7, %c0_8] : memref<32x8xf32, #tpu.memory_space<vmem>>, vector<32x8xf32>
    %20 = arith.addf %18, %19 : vector<32x8xf32>
    %c0_9 = arith.constant 0 : index
    %c0_10 = arith.constant 0 : index
    %21 = vector.load %arg4[%c0_9, %c0_10] : memref<32x8xf32, #tpu.memory_space<vmem>>, vector<32x8xf32>
    tpu.vector_store %arg4[%c0_9, %c0_10], %20 {strides = array<i32>} : memref<32x8xf32, #tpu.memory_space<vmem>>, vector<32x8xf32>,
    return
  }
  func.func @transform_0(%arg0: i32) -> (i32, i32) {
    %c0_i32 = arith.constant 0 : i32
    %c0_i32_0 = arith.constant 0 : i32
    return %arg0, %c0_i32 : i32, i32
  }
  func.func @transform_1(%arg0: i32) -> (i32, i32) {
    %c0_i32 = arith.constant 0 : i32
    %c0_i32_0 = arith.constant 0 : i32
    %c0_i32_1 = arith.constant 0 : i32
    return %c0_i32, %c0_i32_0 : i32, i32
  }
  func.func @transform_2(%arg0: i32) -> (i32, i32) {
    %c0_i32 = arith.constant 0 : i32
    %c0_i32_0 = arith.constant 0 : i32
    %c0_i32_1 = arith.constant 0 : i32
    return %c0_i32, %c0_i32_0 : i32, i32
  }
  func.func @transform_3(%arg0: i32) -> (i32, i32) {
    %c0_i32 = arith.constant 0 : i32
    %c0_i32_0 = arith.constant 0 : i32
    return %arg0, %c0_i32 : i32, i32
  }
}

</mosaic_0001>

<bundles_post_ra>
// kernel: tpu_custom_call.1
= control target key start
LH: loop header
LB: loop body
LE: loop exit
PB: predicated region body
PF: predicated region fallthrough
CT: control target
= control target key end

     0   :  { %s363_s12 = smov 0   ;;  %s423_s0 = inlined_call_operand.vmem [shape: f32[64,8], index: 0, kind: input, shape index: {}]   ;;  %s424_s1 = inlined_call_operand.vmem [shape: f32[32,8], index: 1, kind: input, shape index: {}]   ;;  %s425_s2 = inlined_call_operand.vmem [shape: f32[32,8], index: 2, kind: input, shape index: {}]   ;;  %s426_s3 = inlined_call_operand.vmem [shape: f32[64,8], index: 3, kind: output, shape index: {}]  }
   0x1 LB: > { %s308_s13 = sadd.s32 4294967295, %s341_s12   ;;  %p312_p0 = scmp.ge.s32.totalorder %s341_s12, 1  ;;  %s341_s12 = sphi %s363_s12, %s13_s12  }
   0x2   : > { %p138_p1 = scmp.lt.s32.totalorder %s341_s12, 3 }
   0x4   : > { %p139_p2 = pnand %p312_p0, %p138_p1 }
   0x5   : > { %s313_s14 = sshll.u32 (!%p139_p2), %s308_s13, 2 }
   0x6   : > { %142 = sbr.rel (%p139_p2) target bundleno = 332 (0x14c), region = 32  ;;  %p163_p3 = scmp.lt.s32.totalorder (!%p139_p2), %s313_s14, 7 }
   0xb   : > { %s428_s14 = smov (!%p163_p3, %s313_s14), 7  ;;  %vm178_vm0 = vcmask 64512   ;;  %v232_v41 = vld [vmem:[%s424_s1] sm:$0xff]  ;;  %v233_v46 = vld [vmem:[%s424_s1 + $0x8] sm:$0xff]  ;;  %v234_v50 = vld [vmem:[%s424_s1 + $0x10] sm:$0xff] }
   0xc   : > { %s314_s15 = sshll.u32 %s428_s14, 3  ;;  %v240_v43 = vld [vmem:[%s425_s2] sm:$0xff]  ;;  %v241_v51 = vld [vmem:[%s425_s2 + $0x8] sm:$0xff]  ;;  %v242_v54 = vld [vmem:[%s425_s2 + $0x10] sm:$0xff] }
   0xd   : > { %s166_s18 = scalar_lea.vmem %s423_s0, %s314_s15  ;;  %s172_s25 = scalar_lea.vmem %s426_s3, %s314_s15  ;;  %v235_v57 = vld [vmem:[%s424_s1 + $0x18] sm:$0xff] }
   0xe   : > { %v174_v0 = vld [vmem:[%s166_s18] sm:$0xff]  ;;  %v176_v1 = vld [vmem:[%s166_s18 + $0x10] sm:$0xff]  ;;  %v175_v2 = vld [vmem:[%s166_s18 + $0x8] sm:$0xff] }
   0xf   : > { %v179_v3 = vsel %vm178_vm0, %v174_v0, 0.0  ;;  %v185_v4 = vsel %vm178_vm0, %v176_v1, 0.0  ;;  %v177_v5 = vld [vmem:[%s166_s18 + $0x18] sm:$0xff]  ;;  %v182_v6 = vsel %vm178_vm0, %v175_v2, 0.0 }
  0x10   : > { %180 = vadd.xlane.f32.xlu0 %v179_v3  ;;  %186 = vadd.xlane.f32.xlu1 %v185_v4  ;;  %v188_v7 = vsel %vm178_vm0, %v177_v5, 0.0  ;;  %v243_v61 = vld [vmem:[%s425_s2 + $0x18] sm:$0xff] }
  0x14   : > { %183 = vadd.xlane.f32.xlu0 %v182_v6  ;;  %189 = vadd.xlane.f32.xlu1 %v188_v7 }
  0x99   : > { %v181_v8 = vpop.xlane.xlu0 %180  ;;  %v187_v9 = vpop.xlane.xlu1 %186 }
  0x9a   : > { %v192_v10 = vmul.f32 0.125, %v181_v8  ;;  %v194_v11 = vmul.f32 0.125, %v187_v9 }
  0x9c   : > { %v196_v12 = vsub.f32 %v174_v0, %v192_v10  ;;  %v198_v13 = vsub.f32 %v176_v1, %v194_v11 }
  0x9d   : > { %v184_v14 = vpop.xlane.xlu0 %183  ;;  %v190_v15 = vpop.xlane.xlu1 %189 }
  0x9e   : > { %v193_v16 = vmul.f32 0.125, %v184_v14  ;;  %v195_v17 = vmul.f32 0.125, %v190_v15  ;;  %v200_v18 = vmul.f32 %v196_v12, %v196_v12  ;;  %v202_v19 = vmul.f32 %v198_v13, %v198_v13 }
  0xa0   : > { %v197_v20 = vsub.f32 %v175_v2, %v193_v16  ;;  %v199_v21 = vsub.f32 %v177_v5, %v195_v17  ;;  %v204_v22 = vsel %vm178_vm0, %v200_v18, 0.0  ;;  %v210_v23 = vsel %vm178_vm0, %v202_v19, 0.0 }
  0xa1   : > { %205 = vadd.xlane.f32.xlu0 %v204_v22 }
  0xa2   : > { %v201_v24 = vmul.f32 %v197_v20, %v197_v20  ;;  %v203_v25 = vmul.f32 %v199_v21, %v199_v21 }
  0xa4   : > { %v207_v26 = vsel %vm178_vm0, %v201_v24, 0.0  ;;  %v213_v27 = vsel %vm178_vm0, %v203_v25, 0.0 }
  0xa5   : > { %211 = vadd.xlane.f32.xlu0 %v210_v23  ;;  %208 = vadd.xlane.f32.xlu1 %v207_v26 }
  0xa9   : > { %214 = vadd.xlane.f32.xlu1 %v213_v27 }
 0x12a   : > { %v206_v28 = vpop.xlane.xlu0 %205 }
 0x12b   : > { %v216_v29 = vmul.f32 0.125, %v206_v28 }
 0x12d   : > { %v220_v30 = vadd.f32 1e-06, %v216_v29 }
 0x12e   : > { %v209_v31 = vpop.xlane.xlu1 %208  ;;  %v212_v32 = vpop.xlane.xlu0 %211 }
 0x12f   : > { %327 = vrsqrt.f32 %v220_v30  ;;  %v217_v33 = vmul.f32 0.125, %v209_v31  ;;  %v218_v34 = vmul.f32 0.125, %v212_v32 }
 0x131   : > { %v221_v35 = vadd.f32 1e-06, %v217_v33  ;;  %v222_v36 = vadd.f32 1e-06, %v218_v34 }
 0x132   : > { %v215_v37 = vpop.xlane.xlu1 %214 }
 0x133   : > { %329 = vrsqrt.f32 %v221_v35  ;;  %v219_v38 = vmul.f32 0.125, %v215_v37 }
 0x134   : > { %331 = vrsqrt.f32 %v222_v36 }
 0x135   : > { %v223_v39 = vadd.f32 1e-06, %v219_v38 }
 0x137   : > { %333 = vrsqrt.f32 %v223_v39 }
 0x13c   : > { %v328_v40 = vpop.eup %327 }
 0x13d   : > { %v228_v42 = vmul.f32 %v328_v40, %v196_v12 }
 0x13f   : > { %v236_v44 = vmul.f32 %v232_v41, %v228_v42 }
 0x140   : > { %v330_v45 = vpop.eup %329 }
 0x141   : > { %v332_v47 = vpop.eup %331  ;;  %v244_v48 = vadd.f32 %v240_v43, %v236_v44  ;;  %v229_v49 = vmul.f32 %v330_v45, %v197_v20 }
 0x142   : > { %v230_v52 = vmul.f32 %v332_v47, %v198_v13 }
 0x143   : > { %248 = vst.msk [vmem:[%s172_s25] sm:$0xff] %vm178_vm0, %v244_v48  ;;  %v237_v53 = vmul.f32 %v233_v46, %v229_v49 }
 0x144   : > { %v334_v55 = vpop.eup %333  ;;  %v238_v56 = vmul.f32 %v234_v50, %v230_v52 }
 0x145   : > { %v245_v58 = vadd.f32 %v241_v51, %v237_v53  ;;  %v231_v59 = vmul.f32 %v334_v55, %v199_v21 }
 0x146   : > { %v246_v60 = vadd.f32 %v242_v54, %v238_v56 }
 0x147   : > { %249 = vst.msk [vmem:[%s172_s25 + $0x8] sm:$0xff] %vm178_vm0, %v245_v58  ;;  %v239_v62 = vmul.f32 %v235_v57, %v231_v59 }
 0x148   : > { %250 = vst.msk [vmem:[%s172_s25 + $0x10] sm:$0xff] %vm178_vm0, %v246_v60 }
 0x149   : > { %v247_v63 = vadd.f32 %v243_v61, %v239_v62 }
 0x14b   : > { %251 = vst.msk [vmem:[%s172_s25 + $0x18] sm:$0xff] %vm178_vm0, %v247_v63 }
 0x14c PF: > { %s13_s12 = sadd.s32 1, %s341_s12  }
 0x14d   : > { %p10_p4 = scmp.ge.s32.totalorder %s13_s12, 4  }
 0x14f   :  { %12 = sbr.rel (!%p10_p4) target bundleno = 1 (0x1), region = 62 }

</bundles_post_ra>
